<compile_context>
chip_gen: v6e
topology: v6e:2x2x1
jax: 0.10.0
libtpu: 0.0.40
codegen_flags: <defaults>
</compile_context>

<pallas_src>
import jax
import jax.numpy as jnp
from jax.experimental import pallas as pl
from jax.experimental.pallas import tpu as pltpu

EPS = 1e-6


def _layernorm_kernel(alpha_ref, beta_ref, x_ref, o_ref):
    # x_ref: (row_tile, D) tile in VMEM; alpha/beta: (1,) scalars in SMEM.
    #
    # NOTE: the last grid step may be a *partial* block; rows past the end of
    # the array contain unspecified VMEM data.  Every computation here is
    # strictly per-row (reductions only along axis -1) and Pallas masks the
    # writeback of out-of-bounds rows, so those garbage rows never affect the
    # result.  Do NOT add any cross-row reduction without re-adding padding.
    x = x_ref[...]
    if x.dtype != jnp.float32:
        x = x.astype(jnp.float32)  # only cast sub-32-bit inputs
    d = x.shape[-1]

    mean = jnp.mean(x, axis=-1, keepdims=True)
    centered = x - mean
    # torch.Tensor.std() is unbiased (divides by D-1); guard D == 1.
    denom = d - 1 if d > 1 else 1
    var = jnp.sum(centered * centered, axis=-1, keepdims=True) * (1.0 / denom)
    std = jnp.sqrt(var)

    # Per-row reciprocal (row_tile x 1), then a single fused mul-add output
    # pass:  out = x * scale + shift  with  scale = alpha/(std+eps),
    # shift = beta - mean*scale.  Mathematically identical to
    # alpha*(x-mean)/(std+eps)+beta but `centered` is dead before the store,
    # halving the live f32 working set per tile.
    inv = pl.reciprocal(std + EPS, approx=False)
    a = alpha_ref[0]
    b = beta_ref[0]
    scale = inv * a                    # (row_tile, 1)
    shift = b - mean * scale           # (row_tile, 1)
    o_ref[...] = (x * scale + shift).astype(o_ref.dtype)


def _cdiv(a, b):
    return -(-a // b)


def _round_up(a, m):
    return _cdiv(a, m) * m


def _choose_row_tile(rows, d, itemsize, vmem_tile_budget=8 * 1024 * 1024):
    """Pick the per-step row tile.

    Per-row VMEM cost = double-buffered input + output DMA tiles
    (4 * d * itemsize) plus the in-kernel f32 working set (~2 * d * 4), so
    bf16 inputs are budgeted for the f32 cast they undergo in the kernel.
    Prefers >= 4 grid steps with an even count (DMA overlap + both v7x
    TensorCores busy and balanced) while keeping tiles large (<= 1024 rows;
    mem-bound throughput saturates around 512-1024 rows).
    """
    per_row = 4 * d * itemsize + 2 * d * 4
    cap = min(1024, vmem_tile_budget // per_row)
    cap = max(8, (cap // 8) * 8)

    if rows <= 8 or (rows < 64 and rows <= cap):
        # Tiny input: a single block covering the whole array (a block dim
        # equal to the full array dim is always a legal block shape).
        return rows

    steps = max(4, _cdiv(rows, cap))
    if steps % 2:
        steps += 1                     # even step count for v7x's 2 TCs
    tile = _round_up(_cdiv(rows, steps), 8)
    tile = min(tile, cap, (rows // 8) * 8)
    return max(8, tile)


def pallas_layernorm(x, alpha, beta, *, row_tile=None):
    """Scalar-affine LayerNorm over the last axis of x (any leading dims)."""
    orig_shape = x.shape
    d = orig_shape[-1]
    rows = 1
    for s in orig_shape[:-1]:
        rows *= s
    x2 = x.reshape(rows, d)

    if row_tile is None:
        row_tile = _choose_row_tile(rows, d, x.dtype.itemsize)

    grid = (_cdiv(rows, row_tile),)

    out = pl.pallas_call(
        _layernorm_kernel,
        out_shape=jax.ShapeDtypeStruct((rows, d), x.dtype),
        grid_spec=pltpu.PrefetchScalarGridSpec(
            num_scalar_prefetch=0,
            grid=grid,
            in_specs=[
                pl.BlockSpec(memory_space=pltpu.SMEM),  # alpha (1,)
                pl.BlockSpec(memory_space=pltpu.SMEM),  # beta  (1,)
                pl.BlockSpec((row_tile, d), lambda i: (i, 0)),
            ],
            out_specs=pl.BlockSpec((row_tile, d), lambda i: (i, 0)),
        ),
        compiler_params=pltpu.CompilerParams(
            dimension_semantics=("parallel",),
            # 32 MiB: above v5e's 16 MiB scoped default so large tiles compile
            # there; within v6e/v7x's 32 MiB scoped default (safe for v7x's
            # 64 MiB physical VMEM).
            vmem_limit_bytes=32 * 1024 * 1024,
        ),
    )(alpha, beta, x2)

    return out.reshape(orig_shape)


class Encoder:
    """JAX mirror of the PyTorch Encoder: run layers, then scalar-affine LayerNorm."""

    def __init__(self, layers):
        self.layers = layers
        # LayerNorm params: alpha=ones(1), beta=zeros(1) (deterministic init).
        self.alpha = jnp.ones((1,), jnp.float32)
        self.beta = jnp.zeros((1,), jnp.float32)

    def __call__(self, x, mask):
        for layer in self.layers:
            x = layer(x, mask)
        return pallas_layernorm(x, self.alpha, self.beta)


def _reference_layernorm(x, alpha, beta):
    d = x.shape[-1]
    mean = jnp.mean(x, axis=-1, keepdims=True)
    var = jnp.sum((x - mean) ** 2, axis=-1, keepdims=True) / (d - 1)
    std = jnp.sqrt(var)
    return alpha[0] * (x - mean) / (std + EPS) + beta[0]


if __name__ == "__main__":
    key = jax.random.PRNGKey(0)
    k1, k2, k3 = jax.random.split(key, 3)

    # Small shapes consistent with the module's forward.
    batch, seq, hidden = 2, 8, 32
    x = jax.random.normal(k1, (batch, seq, hidden), jnp.float32)
    mask = jnp.ones((batch, 1, 1, seq), jnp.float32)

    encoder = Encoder(layers=[])  # TODO(synk): encoder layer blocks unspecified in source
    out = jax.block_until_ready(encoder(x, mask))
    ref = _reference_layernorm(x, encoder.alpha, encoder.beta)
    assert out.shape == x.shape
    assert jnp.allclose(out, ref, atol=1e-5, rtol=1e-5)

    # Rows not a multiple of 8: single full-array block (no padding needed).
    x2 = jax.random.normal(k2, (3, 5, hidden), jnp.float32)
    out2 = jax.block_until_ready(pallas_layernorm(x2, encoder.alpha, encoder.beta))
    ref2 = _reference_layernorm(x2, encoder.alpha, encoder.beta)
    assert out2.shape == x2.shape
    assert jnp.allclose(out2, ref2, atol=1e-5, rtol=1e-5)

    # Multi-step grid with a partial boundary block (exercises the no-pad path).
    x3 = jax.random.normal(k3, (5, 17, hidden), jnp.float32)
    out3 = jax.block_until_ready(pallas_layernorm(x3, encoder.alpha, encoder.beta))
    ref3 = _reference_layernorm(x3, encoder.alpha, encoder.beta)
    assert out3.shape == x3.shape
    assert jnp.allclose(out3, ref3, atol=1e-5, rtol=1e-5)

    print("KERNEL_OK")
</pallas_src>

<mosaic_0001>
module attributes {stable_mosaic.version = 11 : i64} {
  func.func @_layernorm_kernel(%arg0: i32, %arg1: memref<1xf32, #tpu.memory_space<smem>>, %arg2: memref<1xf32, #tpu.memory_space<smem>>, %arg3: memref<16x32xf32, #tpu.memory_space<vmem>>, %arg4: memref<16x32xf32, #tpu.memory_space<vmem>>) attributes {dimension_semantics = [#tpu.dimension_semantics<parallel>], iteration_bounds = array<i64: 1>, scalar_prefetch = 0 : i64, scratch_operands = 0 : i64, tpu.core_type = #tpu.core_type<tc>, window_params = [{transform_indices = @transform_0, window_bounds = array<i64: 1>}, {transform_indices = @transform_1, window_bounds = array<i64: 1>}, {transform_indices = @transform_2, window_bounds = array<i64: 16, 32>}, {transform_indices = @transform_3, window_bounds = array<i64: 16, 32>}]} {
    %c0 = arith.constant 0 : index
    %c0_0 = arith.constant 0 : index
    %0 = vector.load %arg3[%c0, %c0_0] : memref<16x32xf32, #tpu.memory_space<vmem>>, vector<16x32xf32>
    %cst = arith.constant dense<0.000000e+00> : vector<16xf32>
    %1 = vector.multi_reduction <add>, %0, %cst [1] : vector<16x32xf32> to vector<16xf32>
    %2 = vector.shape_cast %1 : vector<16xf32> to vector<16x1xf32>
    %cst_1 = arith.constant 3.200000e+01 : f32
    %3 = vector.broadcast %cst_1 : f32 to vector<16x1xf32>
    %4 = arith.divf %2, %3 : vector<16x1xf32>
    %5 = vector.broadcast %4 : vector<16x1xf32> to vector<16x32xf32>
    %6 = arith.subf %0, %5 : vector<16x32xf32>
    %7 = arith.mulf %6, %6 : vector<16x32xf32>
    %cst_2 = arith.constant dense<0.000000e+00> : vector<16xf32>
    %8 = vector.multi_reduction <add>, %7, %cst_2 [1] : vector<16x32xf32> to vector<16xf32>
    %9 = vector.shape_cast %8 : vector<16xf32> to vector<16x1xf32>
    %cst_3 = arith.constant 0.0322580636 : f32
    %10 = vector.broadcast %cst_3 : f32 to vector<16x1xf32>
    %11 = arith.mulf %9, %10 : vector<16x1xf32>
    %12 = math.sqrt %11 : vector<16x1xf32>
    %cst_4 = arith.constant 9.99999997E-7 : f32
    %13 = vector.broadcast %cst_4 : f32 to vector<16x1xf32>
    %14 = arith.addf %12, %13 : vector<16x1xf32>
    %15 = tpu.reciprocal %14 : vector<16x1xf32> -> vector<16x1xf32>
    %c0_5 = arith.constant 0 : index
    %16 = memref.load %arg1[%c0_5] : memref<1xf32, #tpu.memory_space<smem>>
    %c0_6 = arith.constant 0 : index
    %17 = memref.load %arg2[%c0_6] : memref<1xf32, #tpu.memory_space<smem>>
    %18 = vector.broadcast %16 : f32 to vector<16x1xf32>
    %19 = arith.mulf %15, %18 : vector<16x1xf32>
    %20 = arith.mulf %4, %19 : vector<16x1xf32>
    %21 = vector.broadcast %17 : f32 to vector<16x1xf32>
    %22 = arith.subf %21, %20 : vector<16x1xf32>
    %23 = vector.broadcast %19 : vector<16x1xf32> to vector<16x32xf32>
    %24 = arith.mulf %0, %23 : vector<16x32xf32>
    %25 = vector.broadcast %22 : vector<16x1xf32> to vector<16x32xf32>
    %26 = arith.addf %24, %25 : vector<16x32xf32>
    %c0_7 = arith.constant 0 : index
    %c0_8 = arith.constant 0 : index
    %27 = vector.load %arg4[%c0_7, %c0_8] : memref<16x32xf32, #tpu.memory_space<vmem>>, vector<16x32xf32>
    tpu.vector_store %arg4[%c0_7, %c0_8], %26 {strides = array<i32>} : memref<16x32xf32, #tpu.memory_space<vmem>>, vector<16x32xf32>,
    return
  }
  func.func @transform_0(%arg0: i32) -> i32 {
    %c0_i32 = arith.constant 0 : i32
    %c0_i32_0 = arith.constant 0 : i32
    return %c0_i32 : i32
  }
  func.func @transform_1(%arg0: i32) -> i32 {
    %c0_i32 = arith.constant 0 : i32
    %c0_i32_0 = arith.constant 0 : i32
    return %c0_i32 : i32
  }
  func.func @transform_2(%arg0: i32) -> (i32, i32) {
    %c0_i32 = arith.constant 0 : i32
    %c0_i32_0 = arith.constant 0 : i32
    return %arg0, %c0_i32 : i32, i32
  }
  func.func @transform_3(%arg0: i32) -> (i32, i32) {
    %c0_i32 = arith.constant 0 : i32
    %c0_i32_0 = arith.constant 0 : i32
    return %arg0, %c0_i32 : i32, i32
  }
}

</mosaic_0001>

<bundles_post_ra>
// kernel: tpu_custom_call.1
= control target key start
LH: loop header
LB: loop body
LE: loop exit
PB: predicated region body
PF: predicated region fallthrough
CT: control target
= control target key end

     0   :  { %10 = vsyncpa [#allocation5], 0  ;;  %s210_s0 = inlined_call_operand.<no memory space> [shape: f32[1], index: 0, kind: input, shape index: {}]   ;;  %s211_s1 = inlined_call_operand.<no memory space> [shape: f32[1], index: 1, kind: input, shape index: {}]   ;;  %s212_s2 = inlined_call_operand.hbm [shape: f32[16,32], index: 2, kind: input, shape index: {}]   ;;  %s213_s3 = inlined_call_operand.hbm [shape: f32[16,32], index: 3, kind: output, shape index: {}]  }
   0x1   :  { %11 = vsyncpa [#allocation6], 0  ;;  %s162_s12 = smov [#allocation4]  }
   0x2   :  { %s21_s13 = sshll.u32 %s162_s12, 4  ;;  %s22_s13 = int_to_ptr.vmem [resolvable:$true] %s21_s13 }
   0x3   :  { %s126_s14 = scalar_lea.vmem %s22_s13, 256  ;;  %p131_p1 = scmp.lt.s32.totalorder %s22_s13, %s22_s13 }
   0x4   :  { %p127_p0 = scmp.ne.s32.totalorder %s22_s13, %s126_s14  ;;  %p132_p2 = scmp.lt.s32.totalorder %s126_s14, %s126_s14 }
   0x6   :  { %p133_p3 = por %p132_p2, %p131_p1 }
   0x8   :  { %p134_p4 = pnand %p133_p3, %p127_p0 }
   0xa   :  { %137 = shalt.err (!%p134_p4)
}
   0xb   :  { %s163_s15 = smov 128   ;;  %s164_s16 = smov 8  }
   0xc   :  { %27 = dma.hbm_to_vmem [thread:$0]  %s212_s2, 256, %s22_s13, [#allocation5], %s163_s15, %s163_s15, %s164_s16  }
   0xd   :  { %158 = dma.done.wait [#allocation5], 256  }
   0xe   :  { %159 = vsyncadd [#allocation5], 4294967040  ;;  %vm33_vm0 = vcmask 261120   ;;  %v31_v0 = vld [vmem:[#allocation4] sm:$0xff]  ;;  %v32_v1 = vld [vmem:[#allocation4 + $0x8] sm:$0xff]  ;;  %v75_v30 = vstv %s210_s0  ;;  %v80_v33 = vstv %s211_s1  ;;  %s165_s22 = smov [#allocation7]  }
   0xf   :  { %v34_v2 = vsel %vm33_vm0, %v31_v0, 0.0  ;;  %v37_v3 = vsel %vm33_vm0, %v32_v1, 0.0  ;;  %s94_s23 = sshll.u32 %s165_s22, 4  ;;  %s95_s23 = int_to_ptr.vmem [resolvable:$true] %s94_s23 }
  0x10   :  { %35 = vadd.xlane.f32.xlu0 %v34_v2  ;;  %s138_s0 = scalar_lea.vmem %s95_s23, 256  ;;  %p143_p6 = scmp.lt.s32.totalorder %s95_s23, %s95_s23 }
  0x11   :  { %p139_p5 = scmp.ne.s32.totalorder %s95_s23, %s138_s0  ;;  %p144_p7 = scmp.lt.s32.totalorder %s138_s0, %s138_s0 }
  0x13   :  { %p145_p8 = por %p144_p7, %p143_p6 }
  0x14   :  { %38 = vadd.xlane.f32.xlu0 %v37_v3 }
  0x15   :  { %p146_p9 = pnand %p145_p8, %p139_p5 }
  0x99   :  { %v36_v4 = vpop.xlane.xlu0 %35 }
  0x9a   :  { %v41_v5 = vmul.f32 0.03125, %v36_v4 }
  0x9c   :  { %v43_v6 = vsub.f32 %v31_v0, %v41_v5 }
  0x9d   :  { %v39_v7 = vpop.xlane.xlu0 %38 }
  0x9e   :  { %v42_v8 = vmul.f32 0.03125, %v39_v7  ;;  %v45_v9 = vmul.f32 %v43_v6, %v43_v6 }
  0xa0   :  { %v44_v10 = vsub.f32 %v32_v1, %v42_v8  ;;  %v47_v11 = vsel %vm33_vm0, %v45_v9, 0.0 }
  0xa1   :  { %48 = vadd.xlane.f32.xlu1 %v47_v11 }
  0xa2   :  { %v46_v12 = vmul.f32 %v44_v10, %v44_v10 }
  0xa4   :  { %v50_v13 = vsel %vm33_vm0, %v46_v12, 0.0 }
  0xa5   :  { %51 = vadd.xlane.f32.xlu1 %v50_v13 }
 0x12a   :  { %v49_v14 = vpop.xlane.xlu1 %48 }
 0x12b   :  { %v53_v15 = vmul.f32 0.032258064, %v49_v14 }
 0x12d   :  { %110 = vrsqrt.f32 %v53_v15  ;;  %vm57_vm1 = vcmp.eq.f32.partialorder %v53_v15, inf  ;;  %v60_v20 = vand.u32 2147483648, %v53_v15  ;;  %vm59_vm2 = vcmp.eq.f32.partialorder %v53_v15, 0.0 }
 0x12e   :  { %v52_v16 = vpop.xlane.xlu1 %51 }
 0x12f   :  { %v54_v17 = vmul.f32 0.032258064, %v52_v16 }
 0x131   :  { %112 = vrsqrt.f32 %v54_v17  ;;  %vm64_vm3 = vcmp.eq.f32.partialorder %v54_v17, inf  ;;  %v67_v26 = vand.u32 2147483648, %v54_v17  ;;  %vm66_vm4 = vcmp.eq.f32.partialorder %v54_v17, 0.0 }
 0x13a   :  { %v111_v18 = vpop.eup %110 }
 0x13b   :  { %v56_v19 = vmul.f32 %v111_v18, %v53_v15 }
 0x13d   :  { %v58_v21 = vsel %vm57_vm1, %v53_v15, %v56_v19 }
 0x13e   :  { %v113_v22 = vpop.eup %112  ;;  %v61_v23 = vsel %vm59_vm2, %v60_v20, %v58_v21 }
 0x13f   :  { %v69_v24 = vadd.f32 1e-06, %v61_v23  ;;  %v63_v25 = vmul.f32 %v113_v22, %v54_v17 }
 0x141   :  { %114 = vrcp.f32 %v69_v24  ;;  %v65_v27 = vsel %vm64_vm3, %v54_v17, %v63_v25 }
 0x142   :  { %v68_v28 = vsel %vm66_vm4, %v67_v26, %v65_v27 }
 0x143   :  { %v70_v29 = vadd.f32 1e-06, %v68_v28 }
 0x145   :  { %116 = vrcp.f32 %v70_v29 }
 0x14e   :  { %v115_v31 = vpop.eup %114 }
 0x14f   :  { %v76_v32 = vmul.f32 %v115_v31, %v75_v30 }
 0x151   :  { %v78_v34 = vmul.f32 %v76_v32, %v41_v5  ;;  %v83_v38 = vmul.f32 %v76_v32, %v31_v0 }
 0x152   :  { %v117_v35 = vpop.eup %116 }
 0x153   :  { %v77_v36 = vmul.f32 %v117_v35, %v75_v30  ;;  %v81_v37 = vsub.f32 %v80_v33, %v78_v34 }
 0x155   :  { %v79_v39 = vmul.f32 %v77_v36, %v42_v8  ;;  %v85_v40 = vadd.f32 %v83_v38, %v81_v37  ;;  %v84_v42 = vmul.f32 %v77_v36, %v32_v1 }
 0x157   :  { %v82_v41 = vsub.f32 %v80_v33, %v79_v39  ;;  %87 = vst.msk [vmem:[#allocation7] sm:$0xff] %vm33_vm0, %v85_v40 }
 0x159   :  { %v86_v43 = vadd.f32 %v84_v42, %v82_v41 }
 0x15b   :  { %88 = vst.msk [vmem:[#allocation7 + $0x8] sm:$0xff] %vm33_vm0, %v86_v43 }
 0x15c   :  { %149 = shalt.err (!%p146_p9)
}
 0x15d   :  { %100 = dma.vmem_to_hbm [thread:$0]  %s95_s23, 256, %s213_s3, [#allocation6], %s163_s15, %s163_s15, %s164_s16  }
 0x15e   :  { %160 = dma.done.wait [#allocation6], 256  }
 0x15f   :  { %161 = vsyncadd [#allocation6], 4294967040 }
 0x160   :  { %104 = vsyncpa [#allocation5], 1 }
 0x161   :  { %105 = vsyncpa [#allocation6], 1 }

</bundles_post_ra>
